<compile_context>
chip_gen: v6e
topology: v6e:2x2x1
jax: 0.10.0
libtpu: 0.0.40
codegen_flags: <defaults>
</compile_context>

<pallas_src>
import functools

import jax
import jax.numpy as jnp
from jax.experimental import pallas as pl
from jax.experimental.pallas import tpu as pltpu


def _round_up(x, m):
    return ((x + m - 1) // m) * m


def inter_head_kernel(t_ref, g_ref, wt_ref, wg_ref, t_out_ref, g_out_ref):
    """One batch tile of InterHead.forward.

    t_ref, g_ref   : (BT, Dp) f32 activations (lane-dense, Dp % 128 == 0)
    wt_ref, wg_ref : (Dp, Dp) f32 text_fc / graph_fc weights, pre-transposed so that
                     x @ W.T == x @ wt_ref (padded columns/rows are zero)
    t_out_ref, g_out_ref : (BT, Dp) f32
    """
    t = t_ref[...]
    g = g_ref[...]

    # Bias-free linear projections on the MXU, f32 accumulation.
    t_sen = jnp.dot(t, wt_ref[...], preferred_element_type=jnp.float32)
    g_sen = jnp.dot(g, wg_ref[...], preferred_element_type=jnp.float32)

    # Attention logits: row-wise dot products (zero-padded lanes contribute 0).
    a_tt = jnp.sum(t * t_sen, axis=-1, keepdims=True)   # (BT, 1)
    a_tg = jnp.sum(t * g_sen, axis=-1, keepdims=True)
    a_gt = jnp.sum(g * t_sen, axis=-1, keepdims=True)
    a_gg = jnp.sum(g * g_sen, axis=-1, keepdims=True)

    # torch.softmax(torch.stack([a, b]), dim=0) == stable pairwise softmax.
    m1 = jnp.maximum(a_tt, a_tg)
    e_tt = jnp.exp(a_tt - m1)
    e_tg = jnp.exp(a_tg - m1)
    inv1 = pl.reciprocal(e_tt + e_tg, approx=False)
    w_tt = e_tt * inv1
    w_tg = e_tg * inv1

    m2 = jnp.maximum(a_gt, a_gg)
    e_gt = jnp.exp(a_gt - m2)
    e_gg = jnp.exp(a_gg - m2)
    inv2 = pl.reciprocal(e_gt + e_gg, approx=False)
    w_gt = e_gt * inv2
    w_gg = e_gg * inv2

    # NOTE: PyTorch reassigns `text` first, so the new graph uses the *updated* text.
    t_new = w_tt * t + w_tg * g
    g_new = w_gt * t_new + w_gg * g

    t_out_ref[...] = t_new
    g_out_ref[...] = g_new


@functools.partial(jax.jit, static_argnames=("b_tile",))
def inter_head(text, graph, w_text, w_graph, *, b_tile=256):
    """Matches InterHead.forward for text/graph of shape (N, hidden_dim).

    w_text, w_graph: (hidden_dim, hidden_dim) in PyTorch nn.Linear (out, in) layout.
    Returns (text_out, graph_out), each (N, hidden_dim).
    """
    assert text.shape == graph.shape, "text and graph must share a shape"
    B, D = text.shape
    LANE, SUB = 128, 8
    f32 = jnp.float32

    d_p = _round_up(D, LANE)                        # lane-dense hidden dim
    bt = min(_round_up(b_tile, SUB), _round_up(B, SUB))
    b_p = _round_up(B, bt)                          # batch padded to the tile
    grid = (b_p // bt,)

    # Zero-pad activations and (transposed) weights; padded rows/cols stay zero so
    # logits, softmax and outputs for the real rows are unaffected.
    t_p = jnp.pad(text.astype(f32), ((0, b_p - B), (0, d_p - D)))
    g_p = jnp.pad(graph.astype(f32), ((0, b_p - B), (0, d_p - D)))
    wt_p = jnp.pad(w_text.T.astype(f32), ((0, d_p - D), (0, d_p - D)))
    wg_p = jnp.pad(w_graph.T.astype(f32), ((0, d_p - D), (0, d_p - D)))

    act_spec = pl.BlockSpec((bt, d_p), lambda i: (i, 0))
    w_spec = pl.BlockSpec((d_p, d_p), lambda i: (0, 0))   # resident across the grid

    cost = pl.CostEstimate(
        flops=int(2 * 2 * b_p * d_p * d_p + 12 * b_p * d_p),
        transcendentals=int(4 * b_p),
        bytes_accessed=int(4 * (4 * b_p * d_p + 2 * d_p * d_p)),
    )

    t_out, g_out = pl.pallas_call(
        inter_head_kernel,
        out_shape=(
            jax.ShapeDtypeStruct((b_p, d_p), f32),
            jax.ShapeDtypeStruct((b_p, d_p), f32),
        ),
        grid=grid,
        in_specs=[act_spec, act_spec, w_spec, w_spec],
        out_specs=(act_spec, act_spec),
        compiler_params=pltpu.CompilerParams(
            dimension_semantics=("parallel",),
        ),
        cost_estimate=cost,
    )(t_p, g_p, wt_p, wg_p)

    return (t_out[:B, :D].astype(text.dtype),
            g_out[:B, :D].astype(graph.dtype))


if __name__ == "__main__":
    key = jax.random.PRNGKey(0)
    k1, k2, k3, k4 = jax.random.split(key, 4)

    N, HIDDEN = 8, 32                         # text/graph: (num_rows, hidden_dim)
    text = jax.random.normal(k1, (N, HIDDEN), dtype=jnp.float32)
    graph = jax.random.normal(k2, (N, HIDDEN), dtype=jnp.float32)
    # nn.Linear(hidden, hidden, bias=False) weights in PyTorch (out, in) layout.
    w_text = jax.random.normal(k3, (HIDDEN, HIDDEN), dtype=jnp.float32) * 0.1
    w_graph = jax.random.normal(k4, (HIDDEN, HIDDEN), dtype=jnp.float32) * 0.1

    t_out, g_out = inter_head(text, graph, w_text, w_graph)
    t_out, g_out = jax.block_until_ready((t_out, g_out))

    # Pure-JAX reference mirroring the PyTorch forward (incl. text reassignment).
    text_sen = jnp.dot(text, w_text.T, precision="highest")
    graph_sen = jnp.dot(graph, w_graph.T, precision="highest")
    a_tt = (text * text_sen).sum(-1)
    a_tg = (text * graph_sen).sum(-1)
    a_gt = (graph * text_sen).sum(-1)
    a_gg = (graph * graph_sen).sum(-1)
    s1 = jax.nn.softmax(jnp.stack([a_tt, a_tg]), axis=0)
    s2 = jax.nn.softmax(jnp.stack([a_gt, a_gg]), axis=0)
    text_ref = s1[0][:, None] * text + s1[1][:, None] * graph
    graph_ref = s2[0][:, None] * text_ref + s2[1][:, None] * graph

    assert t_out.shape == (N, HIDDEN) and g_out.shape == (N, HIDDEN)
    assert jnp.allclose(t_out, text_ref, atol=1e-4, rtol=1e-4), "text output mismatch"
    assert jnp.allclose(g_out, graph_ref, atol=1e-4, rtol=1e-4), "graph output mismatch"
    print("KERNEL_OK")
</pallas_src>

<mosaic_0001>
module attributes {stable_mosaic.version = 11 : i64} {
  func.func @inter_head_kernel(%arg0: i32, %arg1: memref<8x128xf32, #tpu.memory_space<vmem>>, %arg2: memref<8x128xf32, #tpu.memory_space<vmem>>, %arg3: memref<128x128xf32, #tpu.memory_space<vmem>>, %arg4: memref<128x128xf32, #tpu.memory_space<vmem>>, %arg5: memref<8x128xf32, #tpu.memory_space<vmem>>, %arg6: memref<8x128xf32, #tpu.memory_space<vmem>>) attributes {dimension_semantics = [#tpu.dimension_semantics<parallel>], iteration_bounds = array<i64: 1>, scalar_prefetch = 0 : i64, scratch_operands = 0 : i64, tpu.core_type = #tpu.core_type<tc>, window_params = [{transform_indices = @transform_0, window_bounds = array<i64: 8, 128>}, {transform_indices = @transform_1, window_bounds = array<i64: 8, 128>}, {pipeline_mode = #tpu.pipeline_mode<synchronous>, transform_indices = @transform_2, window_bounds = array<i64: 128, 128>}, {pipeline_mode = #tpu.pipeline_mode<synchronous>, transform_indices = @transform_3, window_bounds = array<i64: 128, 128>}, {transform_indices = @transform_4, window_bounds = array<i64: 8, 128>}, {transform_indices = @transform_5, window_bounds = array<i64: 8, 128>}]} {
    %c0 = arith.constant 0 : index
    %c0_0 = arith.constant 0 : index
    %0 = vector.load %arg1[%c0, %c0_0] : memref<8x128xf32, #tpu.memory_space<vmem>>, vector<8x128xf32>
    %c0_1 = arith.constant 0 : index
    %c0_2 = arith.constant 0 : index
    %1 = vector.load %arg2[%c0_1, %c0_2] : memref<8x128xf32, #tpu.memory_space<vmem>>, vector<8x128xf32>
    %c0_3 = arith.constant 0 : index
    %c0_4 = arith.constant 0 : index
    %2 = vector.load %arg3[%c0_3, %c0_4] : memref<128x128xf32, #tpu.memory_space<vmem>>, vector<128x128xf32>
    %cst = arith.constant dense<0.000000e+00> : vector<8x128xf32>
    %3 = tpu.matmul %0, %2, %cst {dimension_numbers = #tpu.dot_dimension_numbers<[1], [0], [0], [1], [0, 0, 1, 1], [], []>} : vector<8x128xf32>, vector<128x128xf32>, vector<8x128xf32> -> vector<8x128xf32>
    %c0_5 = arith.constant 0 : index
    %c0_6 = arith.constant 0 : index
    %4 = vector.load %arg4[%c0_5, %c0_6] : memref<128x128xf32, #tpu.memory_space<vmem>>, vector<128x128xf32>
    %cst_7 = arith.constant dense<0.000000e+00> : vector<8x128xf32>
    %5 = tpu.matmul %1, %4, %cst_7 {dimension_numbers = #tpu.dot_dimension_numbers<[1], [0], [0], [1], [0, 0, 1, 1], [], []>} : vector<8x128xf32>, vector<128x128xf32>, vector<8x128xf32> -> vector<8x128xf32>
    %6 = arith.mulf %0, %3 : vector<8x128xf32>
    %cst_8 = arith.constant dense<0.000000e+00> : vector<8xf32>
    %7 = vector.multi_reduction <add>, %6, %cst_8 [1] : vector<8x128xf32> to vector<8xf32>
    %8 = vector.shape_cast %7 : vector<8xf32> to vector<8x1xf32>
    %9 = arith.mulf %0, %5 : vector<8x128xf32>
    %cst_9 = arith.constant dense<0.000000e+00> : vector<8xf32>
    %10 = vector.multi_reduction <add>, %9, %cst_9 [1] : vector<8x128xf32> to vector<8xf32>
    %11 = vector.shape_cast %10 : vector<8xf32> to vector<8x1xf32>
    %12 = arith.mulf %1, %3 : vector<8x128xf32>
    %cst_10 = arith.constant dense<0.000000e+00> : vector<8xf32>
    %13 = vector.multi_reduction <add>, %12, %cst_10 [1] : vector<8x128xf32> to vector<8xf32>
    %14 = vector.shape_cast %13 : vector<8xf32> to vector<8x1xf32>
    %15 = arith.mulf %1, %5 : vector<8x128xf32>
    %cst_11 = arith.constant dense<0.000000e+00> : vector<8xf32>
    %16 = vector.multi_reduction <add>, %15, %cst_11 [1] : vector<8x128xf32> to vector<8xf32>
    %17 = vector.shape_cast %16 : vector<8xf32> to vector<8x1xf32>
    %18 = arith.maximumf %8, %11 : vector<8x1xf32>
    %19 = arith.subf %8, %18 : vector<8x1xf32>
    %20 = math.exp %19 : vector<8x1xf32>
    %21 = arith.subf %11, %18 : vector<8x1xf32>
    %22 = math.exp %21 : vector<8x1xf32>
    %23 = arith.addf %20, %22 : vector<8x1xf32>
    %24 = tpu.reciprocal %23 : vector<8x1xf32> -> vector<8x1xf32>
    %25 = arith.mulf %20, %24 : vector<8x1xf32>
    %26 = arith.mulf %22, %24 : vector<8x1xf32>
    %27 = arith.maximumf %14, %17 : vector<8x1xf32>
    %28 = arith.subf %14, %27 : vector<8x1xf32>
    %29 = math.exp %28 : vector<8x1xf32>
    %30 = arith.subf %17, %27 : vector<8x1xf32>
    %31 = math.exp %30 : vector<8x1xf32>
    %32 = arith.addf %29, %31 : vector<8x1xf32>
    %33 = tpu.reciprocal %32 : vector<8x1xf32> -> vector<8x1xf32>
    %34 = arith.mulf %29, %33 : vector<8x1xf32>
    %35 = arith.mulf %31, %33 : vector<8x1xf32>
    %36 = vector.broadcast %25 : vector<8x1xf32> to vector<8x128xf32>
    %37 = arith.mulf %36, %0 : vector<8x128xf32>
    %38 = vector.broadcast %26 : vector<8x1xf32> to vector<8x128xf32>
    %39 = arith.mulf %38, %1 : vector<8x128xf32>
    %40 = arith.addf %37, %39 : vector<8x128xf32>
    %41 = vector.broadcast %34 : vector<8x1xf32> to vector<8x128xf32>
    %42 = arith.mulf %41, %40 : vector<8x128xf32>
    %43 = vector.broadcast %35 : vector<8x1xf32> to vector<8x128xf32>
    %44 = arith.mulf %43, %1 : vector<8x128xf32>
    %45 = arith.addf %42, %44 : vector<8x128xf32>
    %c0_12 = arith.constant 0 : index
    %c0_13 = arith.constant 0 : index
    %46 = vector.load %arg5[%c0_12, %c0_13] : memref<8x128xf32, #tpu.memory_space<vmem>>, vector<8x128xf32>
    tpu.vector_store %arg5[%c0_12, %c0_13], %40 {strides = array<i32>} : memref<8x128xf32, #tpu.memory_space<vmem>>, vector<8x128xf32>,
    %c0_14 = arith.constant 0 : index
    %c0_15 = arith.constant 0 : index
    %47 = vector.load %arg6[%c0_14, %c0_15] : memref<8x128xf32, #tpu.memory_space<vmem>>, vector<8x128xf32>
    tpu.vector_store %arg6[%c0_14, %c0_15], %45 {strides = array<i32>} : memref<8x128xf32, #tpu.memory_space<vmem>>, vector<8x128xf32>,
    return
  }
  func.func @transform_0(%arg0: i32) -> (i32, i32) {
    %c0_i32 = arith.constant 0 : i32
    %c0_i32_0 = arith.constant 0 : i32
    return %arg0, %c0_i32 : i32, i32
  }
  func.func @transform_1(%arg0: i32) -> (i32, i32) {
    %c0_i32 = arith.constant 0 : i32
    %c0_i32_0 = arith.constant 0 : i32
    return %arg0, %c0_i32 : i32, i32
  }
  func.func @transform_2(%arg0: i32) -> (i32, i32) {
    %c0_i32 = arith.constant 0 : i32
    %c0_i32_0 = arith.constant 0 : i32
    %c0_i32_1 = arith.constant 0 : i32
    return %c0_i32, %c0_i32_0 : i32, i32
  }
  func.func @transform_3(%arg0: i32) -> (i32, i32) {
    %c0_i32 = arith.constant 0 : i32
    %c0_i32_0 = arith.constant 0 : i32
    %c0_i32_1 = arith.constant 0 : i32
    return %c0_i32, %c0_i32_0 : i32, i32
  }
  func.func @transform_4(%arg0: i32) -> (i32, i32) {
    %c0_i32 = arith.constant 0 : i32
    %c0_i32_0 = arith.constant 0 : i32
    return %arg0, %c0_i32 : i32, i32
  }
  func.func @transform_5(%arg0: i32) -> (i32, i32) {
    %c0_i32 = arith.constant 0 : i32
    %c0_i32_0 = arith.constant 0 : i32
    return %arg0, %c0_i32 : i32, i32
  }
}

</mosaic_0001>

<bundles_post_ra>
// kernel: inter_head.1
= control target key start
LH: loop header
LB: loop body
LE: loop exit
PB: predicated region body
PF: predicated region fallthrough
CT: control target
= control target key end

     0   :  { %11 = vsyncpa [#allocation3], 0  ;;  %v429_v2 = vmov 0.0   ;;  %s605_s0 = inlined_call_operand.vmem [shape: f32[8,128], index: 0, kind: input, shape index: {}]   ;;  %s606_s1 = inlined_call_operand.vmem [shape: f32[8,128], index: 1, kind: input, shape index: {}]   ;;  %s607_s2 = inlined_call_operand.vmem [shape: f32[128,128], index: 2, kind: input, shape index: {}]   ;;  %s608_s3 = inlined_call_operand.vmem [shape: f32[128,128], index: 3, kind: input, shape index: {}]   ;;  %s609_s4 = inlined_call_operand.hbm [shape: f32[8,128], index: 4, kind: output, shape index: {0}]   ;;  %s610_s5 = inlined_call_operand.hbm [shape: f32[8,128], index: 5, kind: output, shape index: {1}]  }
   0x1   :  { %v38_v0 = vld [vmem:[%s607_s2 + $0x78] sm:$0xff]  ;;  %299 = vmatprep.subr.mxu0 %v429_v2  ;;  %334 = vmatprep.subr.mxu1 %v429_v2  ;;  %v37_v3 = vld [vmem:[%s607_s2 + $0x70] sm:$0xff]  ;;  %v36_v5 = vld [vmem:[%s607_s2 + $0x68] sm:$0xff] }
   0x2   :  { %v124_v1 = vld [vmem:[%s608_s3 + $0x78] sm:$0xff]  ;;  %v123_v4 = vld [vmem:[%s608_s3 + $0x70] sm:$0xff]  ;;  %300 = vmatpush3.msra.mxu0 %v38_v0  ;;  %v122_v6 = vld [vmem:[%s608_s3 + $0x68] sm:$0xff] }
   0x3   :  { %335 = vmatpush3.msra.mxu1 %v124_v1  ;;  %301 = vmatprep.subr.mxu0 %v429_v2  ;;  %v35_v7 = vld [vmem:[%s607_s2 + $0x60] sm:$0xff]  ;;  %v34_v9 = vld [vmem:[%s607_s2 + $0x58] sm:$0xff]  ;;  %v33_v11 = vld [vmem:[%s607_s2 + $0x50] sm:$0xff] }
   0x4   :  { %336 = vmatprep.subr.mxu1 %v429_v2  ;;  %302 = vmatpush3.msra.mxu0 %v37_v3  ;;  %v121_v8 = vld [vmem:[%s608_s3 + $0x60] sm:$0xff]  ;;  %v120_v10 = vld [vmem:[%s608_s3 + $0x58] sm:$0xff]  ;;  %v119_v12 = vld [vmem:[%s608_s3 + $0x50] sm:$0xff] }
   0x5   :  { %337 = vmatpush3.msra.mxu1 %v123_v4  ;;  %303 = vmatprep.subr.mxu0 %v429_v2  ;;  %v32_v13 = vld [vmem:[%s607_s2 + $0x48] sm:$0xff] }
   0x6   :  { %338 = vmatprep.subr.mxu1 %v429_v2  ;;  %304 = vmatpush3.msra.mxu0 %v36_v5  ;;  %v118_v14 = vld [vmem:[%s608_s3 + $0x48] sm:$0xff] }
   0x7   :  { %339 = vmatpush3.msra.mxu1 %v122_v6  ;;  %305 = vmatprep.subr.mxu0 %v429_v2 }
   0x8   :  { %340 = vmatprep.subr.mxu1 %v429_v2  ;;  %306 = vmatpush3.msra.mxu0 %v35_v7 }
   0x9   :  { %341 = vmatpush3.msra.mxu1 %v121_v8  ;;  %307 = vmatprep.subr.mxu0 %v429_v2 }
   0xa   :  { %342 = vmatprep.subr.mxu1 %v429_v2  ;;  %308 = vmatpush3.msra.mxu0 %v34_v9 }
   0xb   :  { %343 = vmatpush3.msra.mxu1 %v120_v10  ;;  %309 = vmatprep.subr.mxu0 %v429_v2 }
   0xc   :  { %344 = vmatprep.subr.mxu1 %v429_v2 }
   0xd   :  { %12 = vsyncpa [#allocation5], 0  ;;  %310 = vmatpush3.msra.mxu0 %v33_v11  ;;  %345 = vmatpush3.msra.mxu1 %v119_v12  ;;  %v31_v15 = vld [vmem:[%s607_s2 + $0x40] sm:$0xff]  ;;  %v30_v17 = vld [vmem:[%s607_s2 + $0x38] sm:$0xff]  ;;  %vm430_vm0 = vmmov 0  }
   0xe   :  { %311 = vmatprep.subr.mxu0 %v429_v2  ;;  %346 = vmatprep.subr.mxu1 %v429_v2  ;;  %v117_v16 = vld [vmem:[%s608_s3 + $0x40] sm:$0xff]  ;;  %v116_v18 = vld [vmem:[%s608_s3 + $0x38] sm:$0xff]  ;;  %v29_v19 = vld [vmem:[%s607_s2 + $0x30] sm:$0xff] }
   0xf   :  { %312 = vmatpush3.msra.mxu0 %v32_v13  ;;  %347 = vmatpush3.msra.mxu1 %v118_v14  ;;  %v115_v20 = vld [vmem:[%s608_s3 + $0x30] sm:$0xff]  ;;  %v28_v21 = vld [vmem:[%s607_s2 + $0x28] sm:$0xff]  ;;  %v27_v23 = vld [vmem:[%s607_s2 + $0x20] sm:$0xff] }
  0x10   :  { %313 = vmatprep.subr.mxu0 %v429_v2  ;;  %348 = vmatprep.subr.mxu1 %v429_v2  ;;  %v114_v22 = vld [vmem:[%s608_s3 + $0x28] sm:$0xff]  ;;  %v113_v24 = vld [vmem:[%s608_s3 + $0x20] sm:$0xff]  ;;  %v26_v25 = vld [vmem:[%s607_s2 + $0x18] sm:$0xff] }
  0x11   :  { %314 = vmatpush3.msra.mxu0 %v31_v15  ;;  %349 = vmatpush3.msra.mxu1 %v117_v16  ;;  %v112_v26 = vld [vmem:[%s608_s3 + $0x18] sm:$0xff]  ;;  %v25_v27 = vld [vmem:[%s607_s2 + $0x10] sm:$0xff]  ;;  %v24_v29 = vld [vmem:[%s607_s2 + $0x8] sm:$0xff] }
  0x12   :  { %315 = vmatprep.subr.mxu0 %v429_v2  ;;  %350 = vmatprep.subr.mxu1 %v429_v2  ;;  %v111_v28 = vld [vmem:[%s608_s3 + $0x10] sm:$0xff]  ;;  %v110_v30 = vld [vmem:[%s608_s3 + $0x8] sm:$0xff]  ;;  %v23_v31 = vld [vmem:[%s607_s2] sm:$0xff] }
  0x13   :  { %316 = vmatpush3.msra.mxu0 %v30_v17  ;;  %351 = vmatpush3.msra.mxu1 %v116_v18  ;;  %v21_v32 = vld [vmem:[%s605_s0] sm:$0xff]  ;;  %s431_s0 = smov [#allocation2]  }
  0x14   :  { %317 = vmatprep.subr.mxu0 %v429_v2  ;;  %352 = vmatprep.subr.mxu1 %v429_v2  ;;  %v109_v33 = vld [vmem:[%s608_s3] sm:$0xff]  ;;  %s432_s3 = smov [#allocation4]  }
  0x15   :  { %318 = vmatpush3.msra.mxu0 %v29_v19  ;;  %353 = vmatpush3.msra.mxu1 %v115_v20  ;;  %v22_v34 = vld [vmem:[%s606_s1] sm:$0xff]  ;;  %s243_s1 = sshll.u32 %s431_s0, 4  ;;  %s253_s10 = sshll.u32 %s432_s3, 4  ;;  %s244_s1 = int_to_ptr.vmem [resolvable:$true] %s243_s1  ;;  %s254_s10 = int_to_ptr.vmem [resolvable:$true] %s253_s10 }
  0x16   :  { %319 = vmatprep.subr.mxu0 %v429_v2  ;;  %354 = vmatprep.subr.mxu1 %v429_v2  ;;  %s385_s11 = scalar_lea.vmem %s244_s1, 128  ;;  %p390_p1 = scmp.lt.s32.totalorder %s244_s1, %s244_s1 }
  0x17   :  { %320 = vmatpush3.msra.mxu0 %v28_v21  ;;  %355 = vmatpush3.msra.mxu1 %v114_v22  ;;  %p386_p0 = scmp.ne.s32.totalorder %s244_s1, %s385_s11  ;;  %p391_p2 = scmp.lt.s32.totalorder %s385_s11, %s385_s11 }
  0x18   :  { %321 = vmatprep.subr.mxu0 %v429_v2  ;;  %356 = vmatprep.subr.mxu1 %v429_v2 }
  0x19   :  { %322 = vmatpush3.msra.mxu0 %v27_v23  ;;  %357 = vmatpush3.msra.mxu1 %v113_v24  ;;  %p392_p3 = por %p391_p2, %p390_p1 }
  0x1a   :  { %323 = vmatprep.subr.mxu0 %v429_v2  ;;  %358 = vmatprep.subr.mxu1 %v429_v2 }
  0x1b   :  { %324 = vmatpush3.msra.mxu0 %v26_v25  ;;  %359 = vmatpush3.msra.mxu1 %v112_v26  ;;  %p393_p4 = pnand %p392_p3, %p386_p0 }
  0x1c   :  { %325 = vmatprep.subr.mxu0 %v429_v2  ;;  %360 = vmatprep.subr.mxu1 %v429_v2 }
  0x1d   :  { %326 = vmatpush3.msra.mxu0 %v25_v27  ;;  %361 = vmatpush3.msra.mxu1 %v111_v28 }
  0x1e   :  { %327 = vmatprep.subr.mxu0 %v429_v2  ;;  %362 = vmatprep.subr.mxu1 %v429_v2 }
  0x1f   :  { %328 = vmatpush3.msra.mxu0 %v24_v29  ;;  %331 = vmatprep.mubr.msk.f32.mxu0 %vm430_vm0, %v429_v2 }
  0x20   :  { %329 = vmatprep.subr.mxu0 %v429_v2  ;;  %363 = vmatpush3.msra.mxu1 %v110_v30 }
  0x21   :  { %330 = vmatpush3.msra.mxu0 %v23_v31  ;;  %364 = vmatprep.subr.mxu1 %v429_v2 }
  0x22   :  { %332 = vmatmul.mubr.f32.vlgmr.msra.gmra.mxu0 %v21_v32  ;;  %365 = vmatpush3.msra.mxu1 %v109_v33 }
  0x23   :  { %366 = vmatprep.mubr.msk.f32.mxu1 %vm430_vm0, %v429_v2 }
  0x24   :  { %367 = vmatmul.mubr.f32.vlgmr.msra.gmra.mxu1 %v22_v34 }
  0xe2   :  { %v105_v35 = vpop.f32.mrf.mxu0 }
  0xe3   :  { %v201_v36 = vmul.f32 %v105_v35, %v22_v34  ;;  %v195_v37 = vmul.f32 %v105_v35, %v21_v32 }
  0xe4   :  { %v333_v38 = vpop.f32.mrf.mxu0  ;;  %v191_v39 = vpop.f32.mrf.mxu1 }
  0xe5   :  { %202 = vadd.xlane.f32.xlu1 %v201_v36  ;;  %196 = vadd.xlane.f32.xlu0 %v195_v37  ;;  %v204_v40 = vmul.f32 %v191_v39, %v22_v34  ;;  %v198_v41 = vmul.f32 %v191_v39, %v21_v32 }
  0xe6   :  { %v368_v42 = vpop.f32.mrf.mxu1 }
  0xe9   :  { %205 = vadd.xlane.f32.xlu1 %v204_v40  ;;  %199 = vadd.xlane.f32.xlu0 %v198_v41 }
 0x16e   :  { %v203_v43 = vpop.xlane.xlu1 %202  ;;  %v197_v44 = vpop.xlane.xlu0 %196 }
 0x172   :  { %v206_v45 = vpop.xlane.xlu1 %205  ;;  %v200_v46 = vpop.xlane.xlu0 %199 }
 0x173   :  { %v218_v47 = vmax.f32 %v203_v43, %v206_v45  ;;  %v207_v48 = vmax.f32 %v197_v44, %v200_v46 }
 0x175   :  { %v219_v49 = vsub.f32 %v203_v43, %v218_v47  ;;  %v222_v50 = vsub.f32 %v206_v45, %v218_v47  ;;  %v208_v51 = vsub.f32 %v197_v44, %v207_v48  ;;  %v211_v52 = vsub.f32 %v200_v46, %v207_v48 }
 0x177   :  { %v220_v53 = vmul.f32 1.442695, %v219_v49  ;;  %v223_v54 = vmul.f32 1.442695, %v222_v50  ;;  %v209_v55 = vmul.f32 1.442695, %v208_v51 }
 0x178   :  { %v212_v56 = vmul.f32 1.442695, %v211_v52 }
 0x179   :  { %373 = vpow2.f32 %v220_v53 }
 0x17a   :  { %375 = vpow2.f32 %v223_v54 }
 0x17b   :  { %377 = vpow2.f32 %v209_v55 }
 0x17c   :  { %379 = vpow2.f32 %v212_v56 }
 0x186   :  { %v374_v57 = vpop.eup %373 }
 0x187   :  { %v376_v58 = vpop.eup %375 }
 0x188   :  { %v378_v59 = vpop.eup %377  ;;  %v225_v60 = vadd.f32 %v376_v58, %v374_v57 }
 0x189   :  { %v380_v61 = vpop.eup %379 }
 0x18a   :  { %v214_v62 = vadd.f32 %v380_v61, %v378_v59  ;;  %381 = vrcp.f32 %v225_v60 }
 0x18c   :  { %383 = vrcp.f32 %v214_v62 }
 0x197   :  { %v382_v63 = vpop.eup %381 }
 0x198   :  { %v228_v5 = vmul.f32 %v382_v63, %v376_v58  ;;  %v227_v7 = vmul.f32 %v382_v63, %v374_v57 }
 0x199   :  { %v384_v0 = vpop.eup %383 }
 0x19a   :  { %v216_v1 = vmul.f32 %v384_v0, %v378_v59  ;;  %v217_v2 = vmul.f32 %v384_v0, %v380_v61  ;;  %v233_v9 = vmul.f32 %v228_v5, %v22_v34 }
 0x19c   :  { %v229_v3 = vmul.f32 %v216_v1, %v21_v32  ;;  %v230_v4 = vmul.f32 %v217_v2, %v22_v34 }
 0x19e   :  { %v231_v6 = vadd.f32 %v230_v4, %v229_v3 }
 0x1a0   :  { %235 = vst [vmem:[#allocation2] sm:$0xff] %v231_v6  ;;  %v232_v8 = vmul.f32 %v231_v6, %v227_v7 }
 0x1a1   :  { %396 = shalt.err (!%p393_p4)
}
 0x1a2   :  { %246 = dma.vmem_to_hbm [thread:$0]  %s244_s1, 128, %s609_s4, [#allocation3]   ;;  %v234_v10 = vadd.f32 %v233_v9, %v232_v8 }
 0x1a3   :  { %s405_s14 = scalar_lea.vmem %s254_s10, 128  ;;  %p410_p6 = scmp.lt.s32.totalorder %s254_s10, %s254_s10 }
 0x1a4   :  { %236 = vst [vmem:[#allocation4] sm:$0xff] %v234_v10  ;;  %p406_p5 = scmp.ne.s32.totalorder %s254_s10, %s405_s14  ;;  %p411_p7 = scmp.lt.s32.totalorder %s405_s14, %s405_s14 }
 0x1a6   :  { %p412_p8 = por %p411_p7, %p410_p6 }
 0x1a8   :  { %p413_p9 = pnand %p412_p8, %p406_p5 }
 0x1aa   :  { %416 = shalt.err (!%p413_p9)
}
 0x1ab   :  { %256 = dma.vmem_to_hbm [thread:$0]  %s254_s10, 128, %s610_s5, [#allocation5]  }
 0x1ac   :  { %425 = dma.done.wait [#allocation3], 128  }
 0x1ad   :  { %426 = vsyncadd [#allocation3], 4294967168 }
 0x1ae   :  { %427 = dma.done.wait [#allocation5], 128  }
 0x1af   :  { %428 = vsyncadd [#allocation5], 4294967168 }
 0x1b0   :  { %263 = vsyncpa [#allocation3], 1 }
 0x1b1   :  { %264 = vsyncpa [#allocation5], 1 }

</bundles_post_ra>
